<compile_context>
chip_gen: v5e
topology: v5e:2x2
jax: 0.10.0
libtpu: 0.0.40
codegen_flags: <defaults>
</compile_context>

<pallas_src>
import functools

import numpy as np

import jax
import jax.numpy as jnp
from jax.experimental import pallas as pl
from jax.experimental.pallas import tpu as pltpu


_VMEM_LIMIT_BYTES = 48 * 1024 * 1024  # largest weight slab is 14.2 MiB bf16;
                                      # 48 MiB is safe on v5e/v6e (128 MiB) and
                                      # v7x (64 MiB physical VMEM).


# ---------------------------------------------------------------------------
# Fused conv kernel: shifted-window im2col + bf16 MXU matmul + epilogue
# ---------------------------------------------------------------------------
def _make_conv_kernel(*, offsets, m, use_mask, in_affine, in_relu, out_relu):
    """Kernel factory.

    Whole-array VMEM-resident operands:
      a    : (R, Cin)  f32     flat activation (R = m + 2*halo for kxk, R = m for 1x1)
      w    : (T, Cin, Cout) bf16  one weight slab per tap
      mask : (T*m, 1)  f32     tap validity mask (padded-window zeroing)
      insc : (1, Cin)  f32     fused input affine scale (producer's BN)
      insh : (1, Cin)  f32     fused input affine shift
      bias : (1, Cout) f32     fused output bias
    Output:
      o    : (m, Cout) f32
    """

    def kernel(*refs):
        it = iter(refs)
        a_ref = next(it)
        w_ref = next(it)
        mask_ref = next(it) if use_mask else None
        insc_ref = next(it) if in_affine else None
        insh_ref = next(it) if in_affine else None
        bias_ref = next(it)
        o_ref = next(it)

        acc = None
        for t, off in enumerate(offsets):
            a = a_ref[pl.ds(off, m), :]                      # (m, Cin) f32
            if in_affine:
                a = a * insc_ref[...] + insh_ref[...]
                if in_relu:
                    a = jnp.maximum(a, 0.0)
            if use_mask:
                a = a * mask_ref[pl.ds(t * m, m), :]         # zero invalid taps
            part = jnp.dot(a.astype(jnp.bfloat16), w_ref[t],
                           preferred_element_type=jnp.float32)
            acc = part if acc is None else acc + part
        out = acc + bias_ref[...]
        if out_relu:
            out = jnp.maximum(out, 0.0)
        o_ref[...] = out

    return kernel


def _pallas_conv(a, w, mask, insc, insh, bias, *, offsets, m,
                 in_affine, in_relu, out_relu):
    use_mask = mask is not None
    cout = w.shape[-1]
    kernel = _make_conv_kernel(offsets=tuple(offsets), m=m, use_mask=use_mask,
                               in_affine=in_affine, in_relu=in_relu,
                               out_relu=out_relu)
    operands = [a, w]
    if use_mask:
        operands.append(mask)
    if in_affine:
        operands.extend([insc, insh])
    operands.append(bias)
    return pl.pallas_call(
        kernel,
        out_shape=jax.ShapeDtypeStruct((m, cout), jnp.float32),
        compiler_params=pltpu.CompilerParams(
            vmem_limit_bytes=_VMEM_LIMIT_BYTES),
    )(*operands)


# ---------------------------------------------------------------------------
# Conv wrappers built on the fused kernel
# ---------------------------------------------------------------------------
def _same_conv_mask(N, H, W, k):
    """(k*k*N*H*W, 1) f32 validity mask for the shifted-window taps."""
    p = (k - 1) // 2
    m = np.arange(N * H * W)
    i = (m % (H * W)) // W
    j = m % W
    rows = []
    for di in range(k):
        for dj in range(k):
            ii = i + di - p
            jj = j + dj - p
            rows.append((ii >= 0) & (ii < H) & (jj >= 0) & (jj < W))
    return np.concatenate(rows).astype(np.float32)[:, None]


def conv_same(x2d, w_k, bias, insc=None, insh=None, *, N, H, W,
              in_relu=False, out_relu=False):
    """k x k stride-1 'same' conv (k odd, incl. k=1) on a flat (N*H*W, Cin)."""
    kk = w_k.shape[0]
    k = int(round(kk ** 0.5))
    m = N * H * W
    in_affine = insc is not None
    if k == 1:
        a, offsets, mask = x2d, (0,), None
    else:
        p = (k - 1) // 2
        halo = p * (W + 1)
        a = jnp.pad(x2d, ((halo, halo), (0, 0)))
        offsets = tuple(halo + (di - p) * W + (dj - p)
                        for di in range(k) for dj in range(k))
        mask = jnp.asarray(_same_conv_mask(N, H, W, k))
    return _pallas_conv(a, w_k, mask, insc, insh, bias, offsets=offsets, m=m,
                        in_affine=in_affine, in_relu=in_relu, out_relu=out_relu)


def conv_strided(x2d, w_flat, bias, *, N, H, W, k, stride, pad, out_relu=False):
    """Strided conv fallback: XLA im2col -> single-tap Pallas matmul.
    Only 4 convs take this path (7x7/2 stem + three 3x3/2 bottleneck convs)."""
    cin = x2d.shape[1]
    x = x2d.reshape(N, H, W, cin)
    xp = jnp.pad(x, ((0, 0), (pad, pad), (pad, pad), (0, 0)))
    ho = (H + 2 * pad - k) // stride + 1
    wo = (W + 2 * pad - k) // stride + 1
    cols = []
    for di in range(k):
        for dj in range(k):
            cols.append(xp[:, di:di + stride * ho:stride,
                           dj:dj + stride * wo:stride, :])
    patches = jnp.concatenate(cols, axis=-1).reshape(N * ho * wo, k * k * cin)
    out = _pallas_conv(patches, w_flat, None, None, None, bias, offsets=(0,),
                       m=N * ho * wo, in_affine=False, in_relu=False,
                       out_relu=out_relu)
    return out, ho, wo


def conv_transpose2(x2d, w_flat, bias4, *, N, H, W):
    """ConvTranspose2d(k=2, s=2): single fused matmul + pixel shuffle."""
    cout = w_flat.shape[-1] // 4
    y = _pallas_conv(x2d, w_flat, None, None, None, bias4, offsets=(0,),
                     m=N * H * W, in_affine=False, in_relu=False,
                     out_relu=False)
    # TODO(synk): write the 4 (r,s) sub-outputs via an output BlockSpec
    # index_map instead of this (tiny) XLA transpose.
    y = y.reshape(N, H, W, cout, 2, 2)
    y = jnp.transpose(y, (0, 1, 4, 2, 5, 3)).reshape(N * 2 * H * 2 * W, cout)
    return y


def bn_scale_shift(x2d, gamma, beta, eps=1e-5):
    """PyTorch train-mode BN (biased batch stats) folded to per-channel affine."""
    x = x2d.astype(jnp.float32)
    mean = jnp.mean(x, axis=0)
    var = jnp.mean(jnp.square(x - mean[None, :]), axis=0)
    scale = gamma * jax.lax.rsqrt(var + eps)
    shift = beta - mean * scale
    return scale[None, :], shift[None, :]


# ---------------------------------------------------------------------------
# Deterministic parameter construction (shapes follow the PyTorch __init__),
# with weights pre-laid-out for the kernel and cast to bf16 once at init.
# ---------------------------------------------------------------------------
class ParamGen:
    def __init__(self, seed=0):
        self.key = jax.random.PRNGKey(seed)

    def _next(self):
        self.key, k = jax.random.split(self.key)
        return k

    def normal(self, shape):
        return jax.random.normal(self._next(), shape, jnp.float32)

    def bn(self, c):
        return jnp.ones((c,), jnp.float32), jnp.zeros((c,), jnp.float32)


def _conv_same_w(pg, cout, cin, k):
    w = pg.normal((cout, cin, k, k)) * (2.0 / (cin * k * k)) ** 0.5
    return jnp.transpose(w, (2, 3, 1, 0)).reshape(k * k, cin, cout).astype(jnp.bfloat16)


def _conv_flat_w(pg, cout, cin, k):
    w = pg.normal((cout, cin, k, k)) * (2.0 / (cin * k * k)) ** 0.5
    return jnp.transpose(w, (2, 3, 1, 0)).reshape(1, k * k * cin, cout).astype(jnp.bfloat16)


def _convT_w(pg, cin, cout):
    w = pg.normal((cin, cout, 2, 2)) * (2.0 / (cin * 4)) ** 0.5
    return (w.reshape(1, cin, cout * 4).astype(jnp.bfloat16),
            jnp.zeros((1, cout * 4), jnp.float32))


def make_bottleneck(pg, in_ch, planes, stride):
    p = dict(c1=_conv_same_w(pg, planes, in_ch, 1), bn1=pg.bn(planes),
             bn2=pg.bn(planes),
             c3=_conv_same_w(pg, planes * 4, planes, 1), bn3=pg.bn(planes * 4))
    if stride == 1:
        p["c2"] = _conv_same_w(pg, planes, planes, 3)
    else:
        p["c2f"] = _conv_flat_w(pg, planes, planes, 3)
    if stride != 1 or in_ch != planes * 4:
        p["ds"] = _conv_same_w(pg, planes * 4, in_ch, 1)
        p["ds_bn"] = pg.bn(planes * 4)
    return p


def make_layer(pg, in_ch, planes, blocks, stride):
    ps = [make_bottleneck(pg, in_ch, planes, stride)]
    for _ in range(blocks - 1):
        ps.append(make_bottleneck(pg, planes * 4, planes, 1))
    return ps


def make_double_conv(pg, cin, cout):
    return dict(w1=_conv_same_w(pg, cout, cin, 3),
                b1=jnp.zeros((1, cout), jnp.float32),
                w2=_conv_same_w(pg, cout, cout, 3),
                b2=jnp.zeros((1, cout), jnp.float32))


def init_deep_res_unet(in_channels, n_classes=12, seed=0):
    pg = ParamGen(seed)
    P = {}
    P["stem"] = dict(conv1=_conv_flat_w(pg, 64, in_channels, 7), bn1=pg.bn(64))
    P["layer1"] = make_layer(pg, 64, 64, 3, 1)          # ResNet101 encoder
    P["layer2"] = make_layer(pg, 256, 128, 4, 2)
    P["layer3"] = make_layer(pg, 512, 256, 23, 2)
    P["layer4"] = make_layer(pg, 1024, 512, 3, 2)

    def dec(cin_up, cout_up, cin_dc, cout_dc):
        up_w, up_b = _convT_w(pg, cin_up, cout_up)
        d = make_double_conv(pg, cin_dc, cout_dc)
        d["up_w"] = up_w
        d["up_b"] = up_b
        return d

    P["dec6"] = dec(2048, 512, 512 + 1024, 512)
    P["dec7"] = dec(512, 256, 256 + 512, 256)
    P["dec8"] = dec(256, 128, 128 + 256, 128)
    P["dec9"] = dec(128, 64, 64 + 64, 64)
    up_w, up_b = _convT_w(pg, 64, 32)
    P["head"] = dict(up_w=up_w, up_b=up_b,
                     w=_conv_same_w(pg, n_classes, 32, 1),
                     b=jnp.zeros((1, n_classes), jnp.float32))
    return P


# ---------------------------------------------------------------------------
# Forward pass (jitted per stage; repeated bottlenecks hit the jit cache)
# ---------------------------------------------------------------------------
@functools.partial(jax.jit, static_argnames=("N", "H", "W"))
def stem_fwd(p, x2d, *, N, H, W):
    raw, ho, wo = conv_strided(x2d, p["conv1"], jnp.zeros((1, 64), jnp.float32),
                               N=N, H=H, W=W, k=7, stride=2, pad=3)
    s, t = bn_scale_shift(raw, *p["bn1"])
    b1 = jnp.maximum(raw * s + t, 0.0)
    # MaxPool2d(kernel=3, stride=2, padding=1) - cheap glue, plain JAX.
    x4 = b1.reshape(N, ho, wo, 64)
    xp = jnp.pad(x4, ((0, 0), (1, 1), (1, 1), (0, 0)),
                 constant_values=-jnp.inf)
    hp = (ho + 2 - 3) // 2 + 1
    wp = (wo + 2 - 3) // 2 + 1
    out = None
    for di in range(3):
        for dj in range(3):
            v = xp[:, di:di + 2 * hp:2, dj:dj + 2 * wp:2, :]
            out = v if out is None else jnp.maximum(out, v)
    return b1, out.reshape(N * hp * wp, 64)


@functools.partial(jax.jit, static_argnames=("N", "H", "W", "stride", "has_ds"))
def bottleneck_fwd(p, x2d, *, N, H, W, stride, has_ds):
    planes = p["c1"].shape[-1]
    planes4 = p["c3"].shape[-1]
    zb = jnp.zeros((1, planes), jnp.float32)
    zb4 = jnp.zeros((1, planes4), jnp.float32)

    raw1 = conv_same(x2d, p["c1"], zb, N=N, H=H, W=W)
    s1, t1 = bn_scale_shift(raw1, *p["bn1"])

    if stride == 1:
        raw2 = conv_same(raw1, p["c2"], zb, s1, t1, N=N, H=H, W=W, in_relu=True)
        Ho, Wo = H, W
    else:
        act1 = jnp.maximum(raw1 * s1 + t1, 0.0)
        raw2, Ho, Wo = conv_strided(act1, p["c2f"], zb, N=N, H=H, W=W,
                                    k=3, stride=stride, pad=1)
    s2, t2 = bn_scale_shift(raw2, *p["bn2"])

    raw3 = conv_same(raw2, p["c3"], zb4, s2, t2, N=N, H=Ho, W=Wo, in_relu=True)
    s3, t3 = bn_scale_shift(raw3, *p["bn3"])

    if has_ds:
        xi = x2d
        if stride != 1:
            cin = x2d.shape[1]
            xi = x2d.reshape(N, H, W, cin)[:, ::stride, ::stride, :]
            xi = xi.reshape(N * Ho * Wo, cin)
        rawd = conv_same(xi, p["ds"], zb4, N=N, H=Ho, W=Wo)
        sd, td = bn_scale_shift(rawd, *p["ds_bn"])
        idt = rawd * sd + td
    else:
        idt = x2d
    return jnp.maximum(raw3 * s3 + t3 + idt, 0.0)


@functools.partial(jax.jit, static_argnames=("N", "H", "W"))
def up_block_fwd(p, x2d, skip2d, *, N, H, W):
    y = conv_transpose2(x2d, p["up_w"], p["up_b"], N=N, H=H, W=W)
    y = jnp.concatenate([y, skip2d], axis=1)
    H2, W2 = 2 * H, 2 * W
    y = conv_same(y, p["w1"], p["b1"], N=N, H=H2, W=W2, out_relu=True)
    y = conv_same(y, p["w2"], p["b2"], N=N, H=H2, W=W2, out_relu=True)
    return y


@functools.partial(jax.jit, static_argnames=("N", "H", "W"))
def head_fwd(p, x2d, *, N, H, W):
    y = conv_transpose2(x2d, p["up_w"], p["up_b"], N=N, H=H, W=W)
    y = conv_same(y, p["w"], p["b"], N=N, H=2 * H, W=2 * W)
    return y


def deep_res_unet_fwd(P, x_nchw):
    n, cin, H, W = x_nchw.shape
    x2d = jnp.transpose(x_nchw, (0, 2, 3, 1)).reshape(n * H * W, cin)
    x2d = x2d.astype(jnp.float32)

    b1, x = stem_fwd(P["stem"], x2d, N=n, H=H, W=W)
    h1, w1 = H // 2, W // 2                       # b1 spatial (after conv1)
    h, w = h1 // 2, w1 // 2                       # after maxpool

    skips = {}
    for name, stride in (("layer1", 1), ("layer2", 2),
                         ("layer3", 2), ("layer4", 2)):
        for bi, bp in enumerate(P[name]):
            s = stride if bi == 0 else 1
            x = bottleneck_fwd(bp, x, N=n, H=h, W=w, stride=s,
                               has_ds=("ds" in bp))
            if bi == 0 and s != 1:
                h, w = h // 2, w // 2
        skips[name] = (x, h, w)

    b2, hb2, wb2 = skips["layer1"]
    b3, hb3, wb3 = skips["layer2"]
    b4, hb4, wb4 = skips["layer3"]
    b5, hb5, wb5 = skips["layer4"]

    y = up_block_fwd(P["dec6"], b5, b4, N=n, H=hb5, W=wb5)
    h, w = 2 * hb5, 2 * wb5
    y = up_block_fwd(P["dec7"], y, b3, N=n, H=h, W=w)
    h, w = 2 * h, 2 * w
    y = up_block_fwd(P["dec8"], y, b2, N=n, H=h, W=w)
    h, w = 2 * h, 2 * w
    y = up_block_fwd(P["dec9"], y, b1, N=n, H=h, W=w)
    h, w = 2 * h, 2 * w
    y = head_fwd(P["head"], y, N=n, H=h, W=w)
    h, w = 2 * h, 2 * w

    return jnp.transpose(y.reshape(n, h, w, -1), (0, 3, 1, 2))   # NHWC -> NCHW


if __name__ == "__main__":
    # Input spatial size must be a multiple of 32 so the 5 stride-2 stages
    # and the U-Net skip connections align.
    batch, in_channels, spatial, n_classes = 2, 4, 32, 12
    assert spatial % 32 == 0

    key = jax.random.PRNGKey(0)
    x = jax.random.normal(key, (batch, in_channels, spatial, spatial),
                          jnp.float32)

    params = init_deep_res_unet(in_channels, n_classes=n_classes, seed=0)
    out = deep_res_unet_fwd(params, x)
    out = jax.block_until_ready(out)

    assert out.shape == (batch, n_classes, spatial, spatial), out.shape
    assert bool(jnp.all(jnp.isfinite(out)))
    print("KERNEL_OK")
</pallas_src>

<mosaic_0001>
module attributes {stable_mosaic.version = 11 : i64} {
  func.func @kernel(%arg0: memref<512x196xf32, #tpu.memory_space<vmem>>, %arg1: memref<1x196x64xbf16, #tpu.memory_space<vmem>>, %arg2: memref<1x64xf32, #tpu.memory_space<vmem>>, %arg3: memref<512x64xf32, #tpu.memory_space<vmem>>) attributes {dimension_semantics = [], scalar_prefetch = 0 : i64, scratch_operands = 0 : i64, tpu.core_type = #tpu.core_type<tc>} {
    %c0 = arith.constant 0 : index
    %c0_0 = arith.constant 0 : index
    %0 = vector.load %arg0[%c0, %c0_0] : memref<512x196xf32, #tpu.memory_space<vmem>>, vector<512x196xf32>
    %1 = arith.truncf %0 : vector<512x196xf32> to vector<512x196xbf16>
    %c0_1 = arith.constant 0 : index
    %c0_2 = arith.constant 0 : index
    %c0_3 = arith.constant 0 : index
    %2 = vector.load %arg1[%c0_1, %c0_2, %c0_3] : memref<1x196x64xbf16, #tpu.memory_space<vmem>>, vector<1x196x64xbf16>
    %3 = vector.shape_cast %2 : vector<1x196x64xbf16> to vector<196x64xbf16>
    %cst = arith.constant dense<0.000000e+00> : vector<512x64xf32>
    %4 = tpu.matmul %1, %3, %cst {dimension_numbers = #tpu.dot_dimension_numbers<[1], [0], [0], [1], [0, 0, 1, 1], [], []>} : vector<512x196xbf16>, vector<196x64xbf16>, vector<512x64xf32> -> vector<512x64xf32>
    %c0_4 = arith.constant 0 : index
    %c0_5 = arith.constant 0 : index
    %5 = vector.load %arg2[%c0_4, %c0_5] : memref<1x64xf32, #tpu.memory_space<vmem>>, vector<1x64xf32>
    %6 = vector.broadcast %5 : vector<1x64xf32> to vector<512x64xf32>
    %7 = arith.addf %4, %6 : vector<512x64xf32>
    %c0_6 = arith.constant 0 : index
    %c0_7 = arith.constant 0 : index
    %8 = vector.load %arg3[%c0_6, %c0_7] : memref<512x64xf32, #tpu.memory_space<vmem>>, vector<512x64xf32>
    tpu.vector_store %arg3[%c0_6, %c0_7], %7 {strides = array<i32>} : memref<512x64xf32, #tpu.memory_space<vmem>>, vector<512x64xf32>,
    return
  }
}

</mosaic_0001>

<bundles_post_ra>
// kernel: stem_fwd.1
= control target key start
LH: loop header
LB: loop body
LE: loop exit
PB: predicated region body
PF: predicated region fallthrough
CT: control target
= control target key end

     0   :  { %vm408_vm0 = vcmask 1041408   ;;  %vm311_vm1 = vcmask 556032   ;;  %vm750_vm2 = vcmask 523264   ;;  %s1731_s1 = inlined_call_operand.vmem [shape: bf16[1,196,64], index: 1, kind: input, shape index: {}]   ;;  %s1732_s0 = inlined_call_operand.vmem [shape: f32[512,196], index: 0, kind: input, shape index: {}]   ;;  %s1733_s2 = inlined_call_operand.vmem [shape: f32[1,64], index: 2, kind: input, shape index: {}]   ;;  %s1734_s3 = inlined_call_operand.vmem [shape: f32[512,64], index: 3, kind: output, shape index: {}]  }
   0x1   :  { %v906_v0 = vld [vmem:[%s1731_s1 + $0x38] sm:$0xff]  ;;  %v231_v1 = vld [vmem:[%s1731_s1 + $0x60] sm:$0x3]  ;;  %v905_v3 = vld [vmem:[%s1731_s1 + $0x30] sm:$0xff] }
   0x2   :  { %v285_v2 = vunpack.c.l.b16 %v231_v1  ;;  %412 = vmatpush.bf16.msra.mxu0 %v906_v0  ;;  %911 = vmatpush.bf16.msra.mxu2 %v906_v0  ;;  %v910_v6 = vld [vmem:[%s1731_s1 + $0x58] sm:$0xff]  ;;  %v904_v7 = vld [vmem:[%s1731_s1 + $0x28] sm:$0xff]  ;;  %v909_v8 = vld [vmem:[%s1731_s1 + $0x50] sm:$0xff] }
   0x3   :  { %v903_v9 = vld [vmem:[%s1731_s1 + $0x20] sm:$0xff]  ;;  %v908_v10 = vld [vmem:[%s1731_s1 + $0x48] sm:$0xff]  ;;  %v902_v11 = vld [vmem:[%s1731_s1 + $0x18] sm:$0xff] }
   0x4   :  { %v298_v4 = vpack.c.b16 %v285_v2, %v285_v2  ;;  %v907_v12 = vld [vmem:[%s1731_s1 + $0x40] sm:$0xff]  ;;  %v901_v13 = vld [vmem:[%s1731_s1 + $0x10] sm:$0xff]  ;;  %v16_v14 = vld [vmem:[%s1732_s0 + $0x8] sm:$0xff] }
   0x5   :  { %v18_v15 = vld [vmem:[%s1732_s0 + $0x18] sm:$0xff]  ;;  %v84_v16 = vld [vmem:[%s1732_s0 + $0x228] sm:$0xff]  ;;  %v899_v21 = vld [vmem:[%s1731_s1] sm:$0xff] }
   0x6   :  { %v410_v5 = vsel %vm408_vm0, %v298_v4, 0  ;;  %413 = vmatpush.bf16.msra.mxu0 %v905_v3  ;;  %912 = vmatpush.bf16.msra.mxu2 %v905_v3  ;;  %v86_v17 = vld [vmem:[%s1732_s0 + $0x238] sm:$0xff]  ;;  %v144_v18 = vpack.c.bf16 %v18_v15, %v16_v14  ;;  %v900_v19 = vld [vmem:[%s1731_s1 + $0x8] sm:$0xff]  ;;  %v15_v22 = vld [vmem:[%s1732_s0] sm:$0xff] }
   0x7   :  { %584 = vmatpush.bf16.msra.mxu1 %v410_v5  ;;  %919 = vmatpush.bf16.msra.mxu3 %v410_v5  ;;  %v178_v20 = vpack.c.bf16 %v86_v17, %v84_v16  ;;  %v17_v23 = vld [vmem:[%s1732_s0 + $0x10] sm:$0xff]  ;;  %v79_v24 = vld [vmem:[%s1732_s0 + $0x200] sm:$0xff]  ;;  %v20_v28 = vld [vmem:[%s1732_s0 + $0x28] sm:$0xff] }
   0x8   :  { %v81_v25 = vld [vmem:[%s1732_s0 + $0x210] sm:$0xff]  ;;  %v143_v26 = vpack.c.bf16 %v17_v23, %v15_v22  ;;  %v22_v29 = vld [vmem:[%s1732_s0 + $0x38] sm:$0xff]  ;;  %v88_v30 = vld [vmem:[%s1732_s0 + $0x248] sm:$0xff] }
   0x9   :  { %v175_v27 = vpack.c.bf16 %v81_v25, %v79_v24  ;;  %v90_v31 = vld [vmem:[%s1732_s0 + $0x258] sm:$0xff]  ;;  %v146_v32 = vpack.c.bf16 %v22_v29, %v20_v28  ;;  %v19_v34 = vld [vmem:[%s1732_s0 + $0x20] sm:$0xff]  ;;  %v21_v35 = vld [vmem:[%s1732_s0 + $0x30] sm:$0xff] }
   0xa   :  { %414 = vmatpush.bf16.msra.mxu0 %v904_v7  ;;  %913 = vmatpush.bf16.msra.mxu2 %v904_v7  ;;  %v180_v33 = vpack.c.bf16 %v90_v31, %v88_v30  ;;  %v83_v36 = vld [vmem:[%s1732_s0 + $0x220] sm:$0xff]  ;;  %v85_v37 = vld [vmem:[%s1732_s0 + $0x230] sm:$0xff]  ;;  %v145_v38 = vpack.c.bf16 %v21_v35, %v19_v34  ;;  %v24_v40 = vld [vmem:[%s1732_s0 + $0x48] sm:$0xff] }
   0xb   :  { %585 = vmatpush.bf16.msra.mxu1 %v910_v6  ;;  %920 = vmatpush.bf16.msra.mxu3 %v910_v6  ;;  %v177_v39 = vpack.c.bf16 %v85_v37, %v83_v36  ;;  %v26_v41 = vld [vmem:[%s1732_s0 + $0x58] sm:$0xff]  ;;  %v92_v42 = vld [vmem:[%s1732_s0 + $0x268] sm:$0xff]  ;;  %v23_v46 = vld [vmem:[%s1732_s0 + $0x40] sm:$0xff] }
   0xc   :  { %v94_v43 = vld [vmem:[%s1732_s0 + $0x278] sm:$0xff]  ;;  %v148_v44 = vpack.c.bf16 %v26_v41, %v24_v40  ;;  %v25_v47 = vld [vmem:[%s1732_s0 + $0x50] sm:$0xff]  ;;  %v87_v48 = vld [vmem:[%s1732_s0 + $0x240] sm:$0xff] }
   0xd   :  { %v182_v45 = vpack.c.bf16 %v94_v43, %v92_v42  ;;  %v89_v49 = vld [vmem:[%s1732_s0 + $0x250] sm:$0xff]  ;;  %v147_v50 = vpack.c.bf16 %v25_v47, %v23_v46  ;;  %v28_v52 = vld [vmem:[%s1732_s0 + $0x68] sm:$0xff]  ;;  %v30_v53 = vld [vmem:[%s1732_s0 + $0x78] sm:$0xff] }
   0xe   :  { %415 = vmatpush.bf16.msra.mxu0 %v903_v9  ;;  %914 = vmatpush.bf16.msra.mxu2 %v903_v9  ;;  %v179_v51 = vpack.c.bf16 %v89_v49, %v87_v48  ;;  %v96_v54 = vld [vmem:[%s1732_s0 + $0x288] sm:$0xff]  ;;  %v98_v55 = vld [vmem:[%s1732_s0 + $0x298] sm:$0xff]  ;;  %v150_v56 = vpack.c.bf16 %v30_v53, %v28_v52  ;;  %v27_v58 = vld [vmem:[%s1732_s0 + $0x60] sm:$0xff] }
   0xf   :  { %586 = vmatpush.bf16.msra.mxu1 %v909_v8  ;;  %921 = vmatpush.bf16.msra.mxu3 %v909_v8  ;;  %v184_v57 = vpack.c.bf16 %v98_v55, %v96_v54  ;;  %v29_v59 = vld [vmem:[%s1732_s0 + $0x70] sm:$0xff]  ;;  %v91_v60 = vld [vmem:[%s1732_s0 + $0x260] sm:$0xff]  ;;  %v32_v0 = vld [vmem:[%s1732_s0 + $0x88] sm:$0xff] }
  0x10   :  { %v93_v61 = vld [vmem:[%s1732_s0 + $0x270] sm:$0xff]  ;;  %v149_v62 = vpack.c.bf16 %v29_v59, %v27_v58  ;;  %v34_v1 = vld [vmem:[%s1732_s0 + $0x98] sm:$0xff]  ;;  %v100_v2 = vld [vmem:[%s1732_s0 + $0x2a8] sm:$0xff] }
  0x11   :  { %v181_v63 = vpack.c.bf16 %v93_v61, %v91_v60  ;;  %v102_v3 = vld [vmem:[%s1732_s0 + $0x2b8] sm:$0xff]  ;;  %v152_v4 = vpack.c.bf16 %v34_v1, %v32_v0  ;;  %v31_v6 = vld [vmem:[%s1732_s0 + $0x80] sm:$0xff]  ;;  %v33_v7 = vld [vmem:[%s1732_s0 + $0x90] sm:$0xff] }
  0x12   :  { %416 = vmatpush.bf16.msra.mxu0 %v902_v11  ;;  %915 = vmatpush.bf16.msra.mxu2 %v902_v11  ;;  %v186_v5 = vpack.c.bf16 %v102_v3, %v100_v2  ;;  %v95_v8 = vld [vmem:[%s1732_s0 + $0x280] sm:$0xff]  ;;  %v97_v9 = vld [vmem:[%s1732_s0 + $0x290] sm:$0xff]  ;;  %v104_v14 = vld [vmem:[%s1732_s0 + $0x2c8] sm:$0xff] }
  0x13   :  { %587 = vmatpush.bf16.msra.mxu1 %v908_v10  ;;  %922 = vmatpush.bf16.msra.mxu3 %v908_v10  ;;  %v151_v10 = vpack.c.bf16 %v33_v7, %v31_v6  ;;  %v183_v11 = vpack.c.bf16 %v97_v9, %v95_v8  ;;  %v106_v15 = vld [vmem:[%s1732_s0 + $0x2d8] sm:$0xff]  ;;  %v40_v24 = vld [vmem:[%s1732_s0 + $0xc8] sm:$0xff]  ;;  %v39_v30 = vld [vmem:[%s1732_s0 + $0xc0] sm:$0xff] }
  0x14   :  { %v188_v17 = vpack.c.bf16 %v106_v15, %v104_v14  ;;  %v42_v25 = vld [vmem:[%s1732_s0 + $0xd8] sm:$0xff]  ;;  %v41_v31 = vld [vmem:[%s1732_s0 + $0xd0] sm:$0xff]  ;;  %v44_v36 = vld [vmem:[%s1732_s0 + $0xe8] sm:$0xff] }
  0x15   :  { %v156_v28 = vpack.c.bf16 %v42_v25, %v40_v24  ;;  %v155_v34 = vpack.c.bf16 %v41_v31, %v39_v30  ;;  %v46_v37 = vld [vmem:[%s1732_s0 + $0xf8] sm:$0xff]  ;;  %v43_v42 = vld [vmem:[%s1732_s0 + $0xe0] sm:$0xff]  ;;  %v45_v43 = vld [vmem:[%s1732_s0 + $0xf0] sm:$0xff] }
  0x16   :  { %417 = vmatpush.bf16.msra.mxu0 %v901_v13  ;;  %916 = vmatpush.bf16.msra.mxu2 %v901_v13  ;;  %v38_v13 = vld [vmem:[%s1732_s0 + $0xb8] sm:$0xff]  ;;  %v158_v40 = vpack.c.bf16 %v46_v37, %v44_v36  ;;  %v157_v46 = vpack.c.bf16 %v45_v43, %v43_v42  ;;  %v48_v48 = vld [vmem:[%s1732_s0 + $0x108] sm:$0xff]  ;;  %v47_v55 = vld [vmem:[%s1732_s0 + $0x100] sm:$0xff] }
  0x17   :  { %588 = vmatpush.bf16.msra.mxu1 %v907_v12  ;;  %923 = vmatpush.bf16.msra.mxu3 %v907_v12  ;;  %v36_v12 = vld [vmem:[%s1732_s0 + $0xa8] sm:$0xff]  ;;  %v50_v49 = vld [vmem:[%s1732_s0 + $0x118] sm:$0xff]  ;;  %v111_v58 = vld [vmem:[%s1732_s0 + $0x300] sm:$0xff] }
  0x18   :  { %v154_v16 = vpack.c.bf16 %v38_v13, %v36_v12  ;;  %v160_v52 = vpack.c.bf16 %v50_v49, %v48_v48  ;;  %v113_v59 = vld [vmem:[%s1732_s0 + $0x310] sm:$0xff]  ;;  %v52_v3 = vld [vmem:[%s1732_s0 + $0x128] sm:$0xff]  ;;  %v122_v6 = vld [vmem:[%s1732_s0 + $0x358] sm:$0xff] }
  0x19   :  { %v191_v0 = vpack.c.bf16 %v113_v59, %v111_v58  ;;  %v51_v15 = vld [vmem:[%s1732_s0 + $0x120] sm:$0xff]  ;;  %v126_v30 = vld [vmem:[%s1732_s0 + $0x378] sm:$0xff]  ;;  %v57_v42 = vld [vmem:[%s1732_s0 + $0x150] sm:$0xff] }
  0x1a   :  { %867 = vmatmul.msk.bf16.vlgmr.msra.gmra.mxu1 %vm311_vm1, %v144_v18  ;;  %418 = vmatpush.bf16.msra.mxu0 %v900_v19  ;;  %v35_v18 = vld [vmem:[%s1732_s0 + $0xa0] sm:$0xff]  ;;  %v128_v58 = vld [vmem:[%s1732_s0 + $0x388] sm:$0xff]  ;;  %v130_v59 = vld [vmem:[%s1732_s0 + $0x398] sm:$0xff] }
  0x1b   :  { %884 = vmatmul.msk.bf16.vlgmr.msra.gmra.mxu3 %vm311_vm1, %v178_v20  ;;  %917 = vmatpush.bf16.msra.mxu2 %v900_v19  ;;  %v37_v19 = vld [vmem:[%s1732_s0 + $0xb0] sm:$0xff]  ;;  %v99_v20 = vld [vmem:[%s1732_s0 + $0x2a0] sm:$0xff] }
  0x1c   :  { %v153_v22 = vpack.c.bf16 %v37_v19, %v35_v18  ;;  %v117_v18 = vld [vmem:[%s1732_s0 + $0x330] sm:$0xff]  ;;  %v119_v43 = vld [vmem:[%s1732_s0 + $0x340] sm:$0xff] }
  0x1e   :  { %419 = vmatpush.bf16.msra.mxu0 %v899_v21 }
  0x1f   :  { %918 = vmatpush.bf16.msra.mxu2 %v899_v21  ;;  %v101_v21 = vld [vmem:[%s1732_s0 + $0x2b0] sm:$0xff] }
  0x20   :  { %v185_v23 = vpack.c.bf16 %v101_v21, %v99_v20 }
  0x21   :  { %420 = vmatmul.bf16.vlgmr.msra.gmra.mxu0 %v143_v26  ;;  %v108_v26 = vld [vmem:[%s1732_s0 + $0x2e8] sm:$0xff] }
  0x22   :  { %500 = vmatmul.bf16.vlgmr.msra.gmra.mxu2 %v175_v27  ;;  %v110_v27 = vld [vmem:[%s1732_s0 + $0x2f8] sm:$0xff] }
  0x23   :  { %v190_v29 = vpack.c.bf16 %v110_v27, %v108_v26  ;;  %v56_v27 = vld [vmem:[%s1732_s0 + $0x148] sm:$0xff] }
  0x2a   :  { %868 = vmatmul.msk.bf16.gmra.mxu1 %vm311_vm1, %v146_v32  ;;  %v103_v32 = vld [vmem:[%s1732_s0 + $0x2c0] sm:$0xff] }
  0x2b   :  { %885 = vmatmul.msk.bf16.gmra.mxu3 %vm311_vm1, %v180_v33  ;;  %v105_v33 = vld [vmem:[%s1732_s0 + $0x2d0] sm:$0xff] }
  0x2c   :  { %v187_v35 = vpack.c.bf16 %v105_v33, %v103_v32 }
  0x31   :  { %425 = vmatmul.bf16.gmra.mxu0 %v145_v38  ;;  %v112_v38 = vld [vmem:[%s1732_s0 + $0x308] sm:$0xff] }
  0x32   :  { %505 = vmatmul.bf16.gmra.mxu2 %v177_v39  ;;  %v114_v39 = vld [vmem:[%s1732_s0 + $0x318] sm:$0xff] }
  0x33   :  { %v192_v41 = vpack.c.bf16 %v114_v39, %v112_v38 }
  0x3a   :  { %869 = vmatmul.msk.bf16.gmra.mxu1 %vm311_vm1, %v148_v44  ;;  %v107_v44 = vld [vmem:[%s1732_s0 + $0x2e0] sm:$0xff] }
  0x3b   :  { %886 = vmatmul.msk.bf16.gmra.mxu3 %vm311_vm1, %v182_v45  ;;  %v109_v45 = vld [vmem:[%s1732_s0 + $0x2f0] sm:$0xff] }
  0x3c   :  { %v189_v47 = vpack.c.bf16 %v109_v45, %v107_v44  ;;  %v121_v44 = vld [vmem:[%s1732_s0 + $0x350] sm:$0xff] }
  0x41   :  { %430 = vmatmul.bf16.gmra.mxu0 %v147_v50  ;;  %v116_v50 = vld [vmem:[%s1732_s0 + $0x328] sm:$0xff] }
  0x42   :  { %510 = vmatmul.bf16.gmra.mxu2 %v179_v51  ;;  %v118_v51 = vld [vmem:[%s1732_s0 + $0x338] sm:$0xff] }
  0x43   :  { %v194_v54 = vpack.c.bf16 %v118_v51, %v116_v50  ;;  %v195_v51 = vpack.c.bf16 %v121_v44, %v119_v43 }
  0x4a   :  { %870 = vmatmul.msk.bf16.gmra.mxu1 %vm311_vm1, %v150_v56  ;;  %v49_v56 = vld [vmem:[%s1732_s0 + $0x110] sm:$0xff] }
  0x4b   :  { %887 = vmatmul.msk.bf16.gmra.mxu3 %vm311_vm1, %v184_v57  ;;  %v1215_v57 = vld [vmem:[%s1733_s2] ss:$0 sm:$0xff]  ;;  %v159_v60 = vpack.c.bf16 %v49_v56, %v47_v55  ;;  %v60_v55 = vld [vmem:[%s1732_s0 + $0x168] sm:$0xff]  ;;  %v62_v56 = vld [vmem:[%s1732_s0 + $0x178] sm:$0xff] }
  0x51   :  { %435 = vmatmul.bf16.gmra.mxu0 %v149_v62 }
  0x52   :  { %515 = vmatmul.bf16.gmra.mxu2 %v181_v63 }
  0x5a   :  { %871 = vmatmul.msk.bf16.gmra.mxu1 %vm311_vm1, %v152_v4  ;;  %v54_v4 = vld [vmem:[%s1732_s0 + $0x138] sm:$0xff] }
  0x5b   :  { %888 = vmatmul.msk.bf16.gmra.mxu3 %vm311_vm1, %v186_v5  ;;  %v120_v5 = vld [vmem:[%s1732_s0 + $0x348] sm:$0xff]  ;;  %v162_v8 = vpack.c.bf16 %v54_v4, %v52_v3 }
  0x5c   :  { %v196_v12 = vpack.c.bf16 %v122_v6, %v120_v5  ;;  %v59_v6 = vld [vmem:[%s1732_s0 + $0x160] sm:$0xff] }
  0x61   :  { %440 = vmatmul.bf16.gmra.mxu0 %v151_v10 }
  0x62   :  { %520 = vmatmul.bf16.gmra.mxu2 %v183_v11 }
  0x6a   :  { %872 = vmatmul.msk.bf16.gmra.mxu1 %vm311_vm1, %v154_v16  ;;  %v53_v16 = vld [vmem:[%s1732_s0 + $0x130] sm:$0xff] }
  0x6b   :  { %889 = vmatmul.msk.bf16.gmra.mxu3 %vm311_vm1, %v188_v17  ;;  %v115_v17 = vld [vmem:[%s1732_s0 + $0x320] sm:$0xff]  ;;  %v161_v20 = vpack.c.bf16 %v53_v16, %v51_v15 }
  0x6c   :  { %v193_v24 = vpack.c.bf16 %v117_v18, %v115_v17 }
  0x71   :  { %445 = vmatmul.bf16.gmra.mxu0 %v153_v22 }
  0x72   :  { %525 = vmatmul.bf16.gmra.mxu2 %v185_v23 }
  0x7a   :  { %873 = vmatmul.msk.bf16.gmra.mxu1 %vm311_vm1, %v156_v28  ;;  %v58_v28 = vld [vmem:[%s1732_s0 + $0x158] sm:$0xff] }
  0x7b   :  { %890 = vmatmul.msk.bf16.gmra.mxu3 %vm311_vm1, %v190_v29  ;;  %v124_v29 = vld [vmem:[%s1732_s0 + $0x368] sm:$0xff]  ;;  %v164_v32 = vpack.c.bf16 %v58_v28, %v56_v27 }
  0x7c   :  { %v198_v37 = vpack.c.bf16 %v126_v30, %v124_v29 }
  0x81   :  { %450 = vmatmul.bf16.gmra.mxu0 %v155_v34 }
  0x82   :  { %530 = vmatmul.bf16.gmra.mxu2 %v187_v35 }
  0x8a   :  { %874 = vmatmul.msk.bf16.gmra.mxu1 %vm311_vm1, %v158_v40 }
  0x8b   :  { %891 = vmatmul.msk.bf16.gmra.mxu3 %vm311_vm1, %v192_v41  ;;  %v55_v41 = vld [vmem:[%s1732_s0 + $0x140] sm:$0xff] }
  0x91   :  { %455 = vmatmul.bf16.gmra.mxu0 %v157_v46  ;;  %v163_v46 = vpack.c.bf16 %v57_v42, %v55_v41 }
  0x92   :  { %535 = vmatmul.bf16.gmra.mxu2 %v189_v47 }
  0x97   :  { %v590_v53 = vpop.f32.mrf.mxu1 }
  0x9a   :  { %875 = vmatmul.msk.bf16.gmra.mxu1 %vm311_vm1, %v160_v52 }
  0x9b   :  { %892 = vmatmul.msk.bf16.gmra.mxu3 %vm311_vm1, %v194_v54 }
  0x9e   :  { %v675_v61 = vpop.f32.mrf.mxu3  ;;  %v421_v63 = vpop.f32.mrf.mxu0 }
  0x9f   :  { %v592_v62 = vpop.f32.mrf.mxu1  ;;  %v422_v1 = vadd.f32 %v1215_v57, %v421_v63 }
  0xa1   :  { %v591_v2 = vadd.f32 %v590_v53, %v422_v1  ;;  %460 = vmatmul.bf16.gmra.mxu0 %v159_v60 }
  0xa2   :  { %540 = vmatmul.bf16.gmra.mxu2 %v191_v0 }
  0xa3   :  { %751 = vst.msk [vmem:[%s1734_s3] sm:$0xff] %vm750_vm2, %v591_v2  ;;  %v200_v2 = vpack.c.bf16 %v130_v59, %v128_v58 }
  0xa5   :  { %v1240_v7 = vpop.f32.mrf.mxu2 }
  0xa6   :  { %v677_v9 = vpop.f32.mrf.mxu3  ;;  %v423_v11 = vpop.f32.mrf.mxu0 }
  0xa7   :  { %v595_v10 = vpop.f32.mrf.mxu1  ;;  %v424_v13 = vadd.f32 %v1215_v57, %v423_v11 }
  0xa9   :  { %v593_v14 = vadd.f32 %v592_v62, %v424_v13 }
  0xaa   :  { %876 = vmatmul.msk.bf16.gmra.mxu1 %vm311_vm1, %v162_v8  ;;  %v61_v8 = vld [vmem:[%s1732_s0 + $0x170] sm:$0xff] }
  0xab   :  { %893 = vmatmul.msk.bf16.gmra.mxu3 %vm311_vm1, %v196_v12  ;;  %752 = vst.msk [vmem:[%s1734_s3 + $0x8] sm:$0xff] %vm750_vm2, %v593_v14  ;;  %v165_v12 = vpack.c.bf16 %v61_v8, %v59_v6 }
  0xad   :  { %v1261_v19 = vpop.f32.mrf.mxu2 }
  0xae   :  { %v680_v21 = vpop.f32.mrf.mxu3  ;;  %v426_v23 = vpop.f32.mrf.mxu0 }
  0xaf   :  { %v597_v22 = vpop.f32.mrf.mxu1  ;;  %v427_v25 = vadd.f32 %v1215_v57, %v426_v23  ;;  %v66_v23 = vld [vmem:[%s1732_s0 + $0x198] sm:$0xff] }
  0xb1   :  { %v596_v26 = vadd.f32 %v595_v10, %v427_v25  ;;  %465 = vmatmul.bf16.gmra.mxu0 %v161_v20  ;;  %v125_v10 = vld [vmem:[%s1732_s0 + $0x370] sm:$0xff]  ;;  %v134_v25 = vld [vmem:[%s1732_s0 + $0x3b8] sm:$0xff] }
  0xb2   :  { %545 = vmatmul.bf16.gmra.mxu2 %v193_v24  ;;  %v132_v24 = vld [vmem:[%s1732_s0 + $0x3a8] sm:$0xff] }
  0xb3   :  { %753 = vst.msk [vmem:[%s1734_s3 + $0x10] sm:$0xff] %vm750_vm2, %v596_v26 }
  0xb5   :  { %v506_v31 = vpop.f32.mrf.mxu2 }
  0xb6   :  { %v682_v33 = vpop.f32.mrf.mxu3  ;;  %v507_v34 = vadd.f32 %v1215_v57, %v506_v31  ;;  %v428_v36 = vpop.f32.mrf.mxu0 }
  0xb7   :  { %v600_v35 = vpop.f32.mrf.mxu1  ;;  %v429_v38 = vadd.f32 %v1215_v57, %v428_v36  ;;  %v63_v36 = vld [vmem:[%s1732_s0 + $0x180] sm:$0xff] }
  0xb8   :  { %v676_v39 = vadd.f32 %v675_v61, %v507_v34  ;;  %v166_v61 = vpack.c.bf16 %v62_v56, %v60_v55 }
  0xb9   :  { %v598_v40 = vadd.f32 %v597_v22, %v429_v38  ;;  %v64_v22 = vld [vmem:[%s1732_s0 + $0x188] sm:$0xff]  ;;  %v127_v38 = vld [vmem:[%s1732_s0 + $0x380] sm:$0xff] }
  0xba   :  { %877 = vmatmul.msk.bf16.gmra.mxu1 %vm311_vm1, %v164_v32  ;;  %785 = vst.msk [vmem:[%s1734_s3 + $0x110] sm:$0xff] %vm750_vm2, %v676_v39  ;;  %v168_v27 = vpack.c.bf16 %v66_v23, %v64_v22  ;;  %v202_v32 = vpack.c.bf16 %v134_v25, %v132_v24  ;;  %v129_v39 = vld [vmem:[%s1732_s0 + $0x390] sm:$0xff] }
  0xbb   :  { %894 = vmatmul.msk.bf16.gmra.mxu3 %vm311_vm1, %v198_v37  ;;  %754 = vst.msk [vmem:[%s1734_s3 + $0x18] sm:$0xff] %vm750_vm2, %v598_v40  ;;  %v65_v37 = vld [vmem:[%s1732_s0 + $0x190] sm:$0xff] }
  0xbc   :  { %v167_v41 = vpack.c.bf16 %v65_v37, %v63_v36 }
  0xbd   :  { %v508_v45 = vpop.f32.mrf.mxu2 }
  0xbe   :  { %v685_v47 = vpop.f32.mrf.mxu3  ;;  %v509_v48 = vadd.f32 %v1215_v57, %v508_v45  ;;  %v431_v50 = vpop.f32.mrf.mxu0 }
  0xbf   :  { %v602_v49 = vpop.f32.mrf.mxu1  ;;  %v432_v52 = vadd.f32 %v1215_v57, %v431_v50  ;;  %v68_v50 = vld [vmem:[%s1732_s0 + $0x1a8] sm:$0xff] }
  0xc0   :  { %v678_v53 = vadd.f32 %v677_v9, %v509_v48  ;;  %v123_v9 = vld [vmem:[%s1732_s0 + $0x360] sm:$0xff] }
  0xc1   :  { %v601_v54 = vadd.f32 %v600_v35, %v432_v52  ;;  %470 = vmatmul.bf16.gmra.mxu0 %v163_v46  ;;  %v197_v17 = vpack.c.bf16 %v125_v10, %v123_v9  ;;  %v199_v46 = vpack.c.bf16 %v129_v39, %v127_v38  ;;  %v136_v52 = vld [vmem:[%s1732_s0 + $0x3c8] sm:$0xff] }
  0xc2   :  { %786 = vst.msk [vmem:[%s1734_s3 + $0x118] sm:$0xff] %vm750_vm2, %v678_v53  ;;  %550 = vmatmul.bf16.gmra.mxu2 %v195_v51  ;;  %v70_v51 = vld [vmem:[%s1732_s0 + $0x1b8] sm:$0xff] }
  0xc3   :  { %755 = vst.msk [vmem:[%s1734_s3 + $0x20] sm:$0xff] %vm750_vm2, %v601_v54  ;;  %v138_v53 = vld [vmem:[%s1732_s0 + $0x3d8] sm:$0xff]  ;;  %v170_v55 = vpack.c.bf16 %v70_v51, %v68_v50 }
  0xc5   :  { %v511_v60 = vpop.f32.mrf.mxu2 }
  0xc6   :  { %v687_v62 = vpop.f32.mrf.mxu3  ;;  %v512_v63 = vadd.f32 %v1215_v57, %v511_v60  ;;  %v433_v1 = vpop.f32.mrf.mxu0 }
  0xc7   :  { %v605_v0 = vpop.f32.mrf.mxu1  ;;  %v434_v3 = vadd.f32 %v1215_v57, %v433_v1  ;;  %v67_v1 = vld [vmem:[%s1732_s0 + $0x1a0] sm:$0xff] }
  0xc8   :  { %v681_v4 = vadd.f32 %v680_v21, %v512_v63 }
  0xc9   :  { %v603_v5 = vadd.f32 %v602_v49, %v434_v3  ;;  %v131_v3 = vld [vmem:[%s1732_s0 + $0x3a0] sm:$0xff] }
  0xca   :  { %878 = vmatmul.msk.bf16.gmra.mxu1 %vm311_vm1, %v166_v61  ;;  %787 = vst.msk [vmem:[%s1734_s3 + $0x120] sm:$0xff] %vm750_vm2, %v681_v4  ;;  %v204_v61 = vpack.c.bf16 %v138_v53, %v136_v52  ;;  %v133_v4 = vld [vmem:[%s1732_s0 + $0x3b0] sm:$0xff] }
  0xcb   :  { %895 = vmatmul.msk.bf16.gmra.mxu3 %vm311_vm1, %v200_v2  ;;  %756 = vst.msk [vmem:[%s1734_s3 + $0x28] sm:$0xff] %vm750_vm2, %v603_v5  ;;  %v69_v2 = vld [vmem:[%s1732_s0 + $0x1b0] sm:$0xff] }
  0xcc   :  { %v169_v6 = vpack.c.bf16 %v69_v2, %v67_v1 }
  0xcd   :  { %v513_v11 = vpop.f32.mrf.mxu2 }
  0xce   :  { %v690_v13 = vpop.f32.mrf.mxu3  ;;  %v514_v14 = vadd.f32 %v1215_v57, %v513_v11  ;;  %v436_v16 = vpop.f32.mrf.mxu0 }
  0xcf   :  { %v607_v15 = vpop.f32.mrf.mxu1  ;;  %v437_v18 = vadd.f32 %v1215_v57, %v436_v16  ;;  %v72_v16 = vld [vmem:[%s1732_s0 + $0x1c8] sm:$0xff] }
  0xd0   :  { %v683_v20 = vadd.f32 %v682_v33, %v514_v14 }
  0xd1   :  { %v606_v21 = vadd.f32 %v605_v0, %v437_v18  ;;  %475 = vmatmul.bf16.gmra.mxu0 %v165_v12  ;;  %v201_v12 = vpack.c.bf16 %v133_v4, %v131_v3  ;;  %v140_v18 = vld [vmem:[%s1732_s0 + $0x3e8] sm:$0xff] }
  0xd2   :  { %788 = vst.msk [vmem:[%s1734_s3 + $0x128] sm:$0xff] %vm750_vm2, %v683_v20  ;;  %555 = vmatmul.bf16.gmra.mxu2 %v197_v17  ;;  %v74_v17 = vld [vmem:[%s1732_s0 + $0x1d8] sm:$0xff] }
  0xd3   :  { %757 = vst.msk [vmem:[%s1734_s3 + $0x30] sm:$0xff] %vm750_vm2, %v606_v21  ;;  %v142_v20 = vld [vmem:[%s1732_s0 + $0x3f8] sm:$0xff]  ;;  %v172_v22 = vpack.c.bf16 %v74_v17, %v72_v16 }
  0xd5   :  { %v516_v26 = vpop.f32.mrf.mxu2 }
  0xd6   :  { %v692_v28 = vpop.f32.mrf.mxu3  ;;  %v517_v29 = vadd.f32 %v1215_v57, %v516_v26  ;;  %v438_v31 = vpop.f32.mrf.mxu0 }
  0xd7   :  { %v610_v30 = vpop.f32.mrf.mxu1  ;;  %v439_v33 = vadd.f32 %v1215_v57, %v438_v31  ;;  %v71_v31 = vld [vmem:[%s1732_s0 + $0x1c0] sm:$0xff] }
  0xd8   :  { %v686_v34 = vadd.f32 %v685_v47, %v517_v29 }
  0xd9   :  { %v608_v35 = vadd.f32 %v607_v15, %v439_v33  ;;  %v135_v33 = vld [vmem:[%s1732_s0 + $0x3c0] sm:$0xff] }
  0xda   :  { %879 = vmatmul.msk.bf16.gmra.mxu1 %vm311_vm1, %v168_v27  ;;  %789 = vst.msk [vmem:[%s1734_s3 + $0x130] sm:$0xff] %vm750_vm2, %v686_v34  ;;  %v206_v27 = vpack.c.bf16 %v142_v20, %v140_v18  ;;  %v137_v34 = vld [vmem:[%s1732_s0 + $0x3d0] sm:$0xff] }
  0xdb   :  { %896 = vmatmul.msk.bf16.gmra.mxu3 %vm311_vm1, %v202_v32  ;;  %758 = vst.msk [vmem:[%s1734_s3 + $0x38] sm:$0xff] %vm750_vm2, %v608_v35  ;;  %v73_v32 = vld [vmem:[%s1732_s0 + $0x1d0] sm:$0xff] }
  0xdc   :  { %v171_v36 = vpack.c.bf16 %v73_v32, %v71_v31 }
  0xdd   :  { %v518_v40 = vpop.f32.mrf.mxu2 }
  0xde   :  { %v695_v42 = vpop.f32.mrf.mxu3  ;;  %v519_v43 = vadd.f32 %v1215_v57, %v518_v40  ;;  %v441_v45 = vpop.f32.mrf.mxu0 }
  0xdf   :  { %v612_v44 = vpop.f32.mrf.mxu1  ;;  %v442_v47 = vadd.f32 %v1215_v57, %v441_v45  ;;  %v76_v45 = vld [vmem:[%s1732_s0 + $0x1e8] sm:$0xff] }
  0xe0   :  { %v688_v48 = vadd.f32 %v687_v62, %v519_v43 }
  0xe1   :  { %v611_v49 = vadd.f32 %v610_v30, %v442_v47  ;;  %480 = vmatmul.bf16.gmra.mxu0 %v167_v41  ;;  %v203_v41 = vpack.c.bf16 %v137_v34, %v135_v33 }
  0xe2   :  { %790 = vst.msk [vmem:[%s1734_s3 + $0x138] sm:$0xff] %vm750_vm2, %v688_v48  ;;  %560 = vmatmul.bf16.gmra.mxu2 %v199_v46  ;;  %v78_v46 = vld [vmem:[%s1732_s0 + $0x1f8] sm:$0xff] }
  0xe3   :  { %759 = vst.msk [vmem:[%s1734_s3 + $0x40] sm:$0xff] %vm750_vm2, %v611_v49  ;;  %v174_v48 = vpack.c.bf16 %v78_v46, %v76_v45 }
  0xe5   :  { %v521_v54 = vpop.f32.mrf.mxu2 }
  0xe6   :  { %v697_v56 = vpop.f32.mrf.mxu3  ;;  %v522_v58 = vadd.f32 %v1215_v57, %v521_v54  ;;  %v443_v60 = vpop.f32.mrf.mxu0 }
  0xe7   :  { %v615_v59 = vpop.f32.mrf.mxu1  ;;  %v444_v62 = vadd.f32 %v1215_v57, %v443_v60  ;;  %v141_v60 = vld [vmem:[%s1732_s0 + $0x3f0] sm:$0xff] }
  0xe8   :  { %v691_v63 = vadd.f32 %v690_v13, %v522_v58  ;;  %v77_v58 = vld [vmem:[%s1732_s0 + $0x1f0] sm:$0xff] }
  0xe9   :  { %v613_v0 = vadd.f32 %v612_v44, %v444_v62 }
  0xea   :  { %880 = vmatmul.msk.bf16.gmra.mxu1 %vm311_vm1, %v170_v55  ;;  %791 = vst.msk [vmem:[%s1734_s3 + $0x140] sm:$0xff] %vm750_vm2, %v691_v63 }
  0xeb   :  { %897 = vmatmul.msk.bf16.gmra.mxu3 %vm311_vm1, %v204_v61  ;;  %760 = vst.msk [vmem:[%s1734_s3 + $0x48] sm:$0xff] %vm750_vm2, %v613_v0 }
  0xed   :  { %v523_v5 = vpop.f32.mrf.mxu2 }
  0xee   :  { %v700_v8 = vpop.f32.mrf.mxu3  ;;  %v524_v9 = vadd.f32 %v1215_v57, %v523_v5  ;;  %v446_v11 = vpop.f32.mrf.mxu0 }
  0xef   :  { %v617_v10 = vpop.f32.mrf.mxu1  ;;  %v447_v13 = vadd.f32 %v1215_v57, %v446_v11 }
  0xf0   :  { %v693_v14 = vadd.f32 %v692_v28, %v524_v9  ;;  %v82_v9 = vld [vmem:[%s1732_s0 + $0x218] sm:$0xff] }
  0xf1   :  { %v616_v15 = vadd.f32 %v615_v59, %v447_v13  ;;  %485 = vmatmul.bf16.gmra.mxu0 %v169_v6  ;;  %v139_v59 = vld [vmem:[%s1732_s0 + $0x3e0] sm:$0xff] }
  0xf2   :  { %792 = vst.msk [vmem:[%s1734_s3 + $0x148] sm:$0xff] %vm750_vm2, %v693_v14  ;;  %565 = vmatmul.bf16.gmra.mxu2 %v201_v12  ;;  %v205_v3 = vpack.c.bf16 %v141_v60, %v139_v59 }
  0xf3   :  { %761 = vst.msk [vmem:[%s1734_s3 + $0x50] sm:$0xff] %vm750_vm2, %v616_v15 }
  0xf5   :  { %v526_v21 = vpop.f32.mrf.mxu2 }
  0xf6   :  { %v702_v23 = vpop.f32.mrf.mxu3  ;;  %v527_v24 = vadd.f32 %v1215_v57, %v526_v21  ;;  %v448_v26 = vpop.f32.mrf.mxu0 }
  0xf7   :  { %v620_v25 = vpop.f32.mrf.mxu1  ;;  %v449_v28 = vadd.f32 %v1215_v57, %v448_v26 }
  0xf8   :  { %v696_v29 = vadd.f32 %v695_v42, %v527_v24 }
  0xf9   :  { %v618_v30 = vadd.f32 %v617_v10, %v449_v28 }
  0xfa   :  { %881 = vmatmul.msk.bf16.gmra.mxu1 %vm311_vm1, %v172_v22  ;;  %793 = vst.msk [vmem:[%s1734_s3 + $0x150] sm:$0xff] %vm750_vm2, %v696_v29 }
  0xfb   :  { %898 = vmatmul.msk.bf16.gmra.mxu3 %vm311_vm1, %v206_v27  ;;  %762 = vst.msk [vmem:[%s1734_s3 + $0x58] sm:$0xff] %vm750_vm2, %v618_v30 }
  0xfd   :  { %v528_v35 = vpop.f32.mrf.mxu2 }
  0xfe   :  { %v705_v37 = vpop.f32.mrf.mxu3  ;;  %v529_v38 = vadd.f32 %v1215_v57, %v528_v35  ;;  %v451_v40 = vpop.f32.mrf.mxu0 }
  0xff   :  { %v622_v39 = vpop.f32.mrf.mxu1  ;;  %v452_v42 = vadd.f32 %v1215_v57, %v451_v40 }
 0x100   :  { %v698_v43 = vadd.f32 %v697_v56, %v529_v38  ;;  %v75_v56 = vld [vmem:[%s1732_s0 + $0x1e0] sm:$0xff] }
 0x101   :  { %v621_v44 = vadd.f32 %v620_v25, %v452_v42  ;;  %490 = vmatmul.bf16.gmra.mxu0 %v171_v36  ;;  %v173_v62 = vpack.c.bf16 %v77_v58, %v75_v56 }
 0x102   :  { %794 = vst.msk [vmem:[%s1734_s3 + $0x158] sm:$0xff] %vm750_vm2, %v698_v43  ;;  %570 = vmatmul.bf16.gmra.mxu2 %v203_v41 }
 0x103   :  { %763 = vst.msk [vmem:[%s1734_s3 + $0x60] sm:$0xff] %vm750_vm2, %v621_v44 }
 0x105   :  { %v531_v47 = vpop.f32.mrf.mxu2 }
 0x106   :  { %v707_v49 = vpop.f32.mrf.mxu3  ;;  %v532_v50 = vadd.f32 %v1215_v57, %v531_v47  ;;  %v453_v52 = vpop.f32.mrf.mxu0 }
 0x107   :  { %v625_v51 = vpop.f32.mrf.mxu1  ;;  %v454_v53 = vadd.f32 %v1215_v57, %v453_v52 }
 0x108   :  { %v701_v54 = vadd.f32 %v700_v8, %v532_v50  ;;  %v80_v8 = vld [vmem:[%s1732_s0 + $0x208] sm:$0xff] }
 0x109   :  { %v623_v55 = vadd.f32 %v622_v39, %v454_v53  ;;  %v176_v11 = vpack.c.bf16 %v82_v9, %v80_v8 }
 0x10a   :  { %882 = vmatmul.msk.bf16.gmra.mxu1 %vm311_vm1, %v174_v48  ;;  %795 = vst.msk [vmem:[%s1734_s3 + $0x160] sm:$0xff] %vm750_vm2, %v701_v54 }
 0x10b   :  { %764 = vst.msk [vmem:[%s1734_s3 + $0x68] sm:$0xff] %vm750_vm2, %v623_v55 }
 0x10d   :  { %v533_v61 = vpop.f32.mrf.mxu2 }
 0x10e   :  { %v710_v63 = vpop.f32.mrf.mxu3  ;;  %v534_v0 = vadd.f32 %v1215_v57, %v533_v61  ;;  %v456_v2 = vpop.f32.mrf.mxu0 }
 0x10f   :  { %v627_v1 = vpop.f32.mrf.mxu1  ;;  %v457_v4 = vadd.f32 %v1215_v57, %v456_v2 }
 0x110   :  { %v703_v5 = vadd.f32 %v702_v23, %v534_v0 }
 0x111   :  { %v626_v6 = vadd.f32 %v625_v51, %v457_v4  ;;  %495 = vmatmul.bf16.gmra.mxu0 %v173_v62 }
 0x112   :  { %796 = vst.msk [vmem:[%s1734_s3 + $0x168] sm:$0xff] %vm750_vm2, %v703_v5  ;;  %575 = vmatmul.bf16.gmra.mxu2 %v205_v3 }
 0x113   :  { %765 = vst.msk [vmem:[%s1734_s3 + $0x70] sm:$0xff] %vm750_vm2, %v626_v6 }
 0x115   :  { %v536_v10 = vpop.f32.mrf.mxu2 }
 0x116   :  { %v712_v12 = vpop.f32.mrf.mxu3  ;;  %v537_v13 = vadd.f32 %v1215_v57, %v536_v10  ;;  %v458_v15 = vpop.f32.mrf.mxu0 }
 0x117   :  { %v630_v14 = vpop.f32.mrf.mxu1  ;;  %v459_v16 = vadd.f32 %v1215_v57, %v458_v15 }
 0x118   :  { %v706_v17 = vadd.f32 %v705_v37, %v537_v13 }
 0x119   :  { %v628_v18 = vadd.f32 %v627_v1, %v459_v16 }
 0x11a   :  { %883 = vmatmul.msk.bf16.gmra.mxu1 %vm311_vm1, %v176_v11  ;;  %797 = vst.msk [vmem:[%s1734_s3 + $0x170] sm:$0xff] %vm750_vm2, %v706_v17 }
 0x11b   :  { %766 = vst.msk [vmem:[%s1734_s3 + $0x78] sm:$0xff] %vm750_vm2, %v628_v18 }
 0x11d   :  { %v538_v20 = vpop.f32.mrf.mxu2 }
 0x11e   :  { %v715_v21 = vpop.f32.mrf.mxu3  ;;  %v539_v22 = vadd.f32 %v1215_v57, %v538_v20  ;;  %v461_v24 = vpop.f32.mrf.mxu0 }
 0x11f   :  { %v632_v23 = vpop.f32.mrf.mxu1  ;;  %v462_v25 = vadd.f32 %v1215_v57, %v461_v24 }
 0x120   :  { %v708_v26 = vadd.f32 %v707_v49, %v539_v22 }
 0x121   :  { %v631_v27 = vadd.f32 %v630_v14, %v462_v25 }
 0x122   :  { %798 = vst.msk [vmem:[%s1734_s3 + $0x178] sm:$0xff] %vm750_vm2, %v708_v26 }
 0x123   :  { %767 = vst.msk [vmem:[%s1734_s3 + $0x80] sm:$0xff] %vm750_vm2, %v631_v27 }
 0x125   :  { %v541_v28 = vpop.f32.mrf.mxu2 }
 0x126   :  { %v542_v29 = vadd.f32 %v1215_v57, %v541_v28  ;;  %v463_v31 = vpop.f32.mrf.mxu0  ;;  %v717_v33 = vpop.f32.mrf.mxu3 }
 0x127   :  { %v635_v30 = vpop.f32.mrf.mxu1  ;;  %v464_v32 = vadd.f32 %v1215_v57, %v463_v31 }
 0x128   :  { %v711_v34 = vadd.f32 %v710_v63, %v542_v29 }
 0x129   :  { %v633_v35 = vadd.f32 %v632_v23, %v464_v32 }
 0x12a   :  { %799 = vst.msk [vmem:[%s1734_s3 + $0x180] sm:$0xff] %vm750_vm2, %v711_v34 }
 0x12b   :  { %768 = vst.msk [vmem:[%s1734_s3 + $0x88] sm:$0xff] %vm750_vm2, %v633_v35 }
 0x12d   :  { %v543_v36 = vpop.f32.mrf.mxu2 }
 0x12e   :  { %v544_v37 = vadd.f32 %v1215_v57, %v543_v36  ;;  %v466_v39 = vpop.f32.mrf.mxu0  ;;  %v720_v43 = vpop.f32.mrf.mxu3 }
 0x12f   :  { %v637_v38 = vpop.f32.mrf.mxu1  ;;  %v467_v40 = vadd.f32 %v1215_v57, %v466_v39 }
 0x130   :  { %v713_v41 = vadd.f32 %v712_v12, %v544_v37 }
 0x131   :  { %v636_v42 = vadd.f32 %v635_v30, %v467_v40 }
 0x132   :  { %800 = vst.msk [vmem:[%s1734_s3 + $0x188] sm:$0xff] %vm750_vm2, %v713_v41 }
 0x133   :  { %769 = vst.msk [vmem:[%s1734_s3 + $0x90] sm:$0xff] %vm750_vm2, %v636_v42 }
 0x135   :  { %v546_v44 = vpop.f32.mrf.mxu2 }
 0x136   :  { %v547_v45 = vadd.f32 %v1215_v57, %v546_v44  ;;  %v468_v47 = vpop.f32.mrf.mxu0  ;;  %v722_v51 = vpop.f32.mrf.mxu3 }
 0x137   :  { %v640_v46 = vpop.f32.mrf.mxu1  ;;  %v469_v48 = vadd.f32 %v1215_v57, %v468_v47 }
 0x138   :  { %v716_v49 = vadd.f32 %v715_v21, %v547_v45 }
 0x139   :  { %v638_v50 = vadd.f32 %v637_v38, %v469_v48 }
 0x13a   :  { %801 = vst.msk [vmem:[%s1734_s3 + $0x190] sm:$0xff] %vm750_vm2, %v716_v49 }
 0x13b   :  { %770 = vst.msk [vmem:[%s1734_s3 + $0x98] sm:$0xff] %vm750_vm2, %v638_v50 }
 0x13d   :  { %v548_v52 = vpop.f32.mrf.mxu2 }
 0x13e   :  { %v549_v53 = vadd.f32 %v1215_v57, %v548_v52  ;;  %v471_v55 = vpop.f32.mrf.mxu0  ;;  %v725_v61 = vpop.f32.mrf.mxu3 }
 0x13f   :  { %v642_v54 = vpop.f32.mrf.mxu1  ;;  %v472_v56 = vadd.f32 %v1215_v57, %v471_v55 }
 0x140   :  { %v718_v58 = vadd.f32 %v717_v33, %v549_v53 }
 0x141   :  { %v641_v59 = vadd.f32 %v640_v46, %v472_v56 }
 0x142   :  { %802 = vst.msk [vmem:[%s1734_s3 + $0x198] sm:$0xff] %vm750_vm2, %v718_v58 }
 0x143   :  { %771 = vst.msk [vmem:[%s1734_s3 + $0xa0] sm:$0xff] %vm750_vm2, %v641_v59 }
 0x145   :  { %v551_v60 = vpop.f32.mrf.mxu2 }
 0x146   :  { %v552_v62 = vadd.f32 %v1215_v57, %v551_v60  ;;  %v473_v0 = vpop.f32.mrf.mxu0  ;;  %v727_v10 = vpop.f32.mrf.mxu3 }
 0x147   :  { %v645_v63 = vpop.f32.mrf.mxu1  ;;  %v474_v1 = vadd.f32 %v1215_v57, %v473_v0 }
 0x148   :  { %v721_v2 = vadd.f32 %v720_v43, %v552_v62 }
 0x149   :  { %v643_v3 = vadd.f32 %v642_v54, %v474_v1 }
 0x14a   :  { %803 = vst.msk [vmem:[%s1734_s3 + $0x1a0] sm:$0xff] %vm750_vm2, %v721_v2 }
 0x14b   :  { %772 = vst.msk [vmem:[%s1734_s3 + $0xa8] sm:$0xff] %vm750_vm2, %v643_v3 }
 0x14d   :  { %v553_v4 = vpop.f32.mrf.mxu2 }
 0x14e   :  { %v554_v5 = vadd.f32 %v1215_v57, %v553_v4  ;;  %v476_v8 = vpop.f32.mrf.mxu0  ;;  %v730_v21 = vpop.f32.mrf.mxu3 }
 0x14f   :  { %v647_v6 = vpop.f32.mrf.mxu1  ;;  %v477_v9 = vadd.f32 %v1215_v57, %v476_v8 }
 0x150   :  { %v723_v11 = vadd.f32 %v722_v51, %v554_v5 }
 0x151   :  { %v646_v12 = vadd.f32 %v645_v63, %v477_v9 }
 0x152   :  { %804 = vst.msk [vmem:[%s1734_s3 + $0x1a8] sm:$0xff] %vm750_vm2, %v723_v11 }
 0x153   :  { %773 = vst.msk [vmem:[%s1734_s3 + $0xb0] sm:$0xff] %vm750_vm2, %v646_v12 }
 0x155   :  { %v556_v13 = vpop.f32.mrf.mxu2 }
 0x156   :  { %v557_v14 = vadd.f32 %v1215_v57, %v556_v13  ;;  %v478_v16 = vpop.f32.mrf.mxu0  ;;  %v732_v29 = vpop.f32.mrf.mxu3 }
 0x157   :  { %v650_v15 = vpop.f32.mrf.mxu1  ;;  %v479_v17 = vadd.f32 %v1215_v57, %v478_v16 }
 0x158   :  { %v726_v18 = vadd.f32 %v725_v61, %v557_v14  ;;  %v502_v14 = vadd.f32 %v1215_v57, %v1240_v7  ;;  %v504_v7 = vadd.f32 %v1215_v57, %v1261_v19 }
 0x159   :  { %v648_v20 = vadd.f32 %v647_v6, %v479_v17 }
 0x15a   :  { %805 = vst.msk [vmem:[%s1734_s3 + $0x1b0] sm:$0xff] %vm750_vm2, %v726_v18 }
 0x15b   :  { %774 = vst.msk [vmem:[%s1734_s3 + $0xb8] sm:$0xff] %vm750_vm2, %v648_v20 }
 0x15d   :  { %v558_v22 = vpop.f32.mrf.mxu2 }
 0x15e   :  { %v559_v23 = vadd.f32 %v1215_v57, %v558_v22  ;;  %v481_v25 = vpop.f32.mrf.mxu0  ;;  %v735_v38 = vpop.f32.mrf.mxu3 }
 0x15f   :  { %v652_v24 = vpop.f32.mrf.mxu1  ;;  %v482_v26 = vadd.f32 %v1215_v57, %v481_v25 }
 0x160   :  { %v728_v27 = vadd.f32 %v727_v10, %v559_v23 }
 0x161   :  { %v651_v28 = vadd.f32 %v650_v15, %v482_v26 }
 0x162   :  { %806 = vst.msk [vmem:[%s1734_s3 + $0x1b8] sm:$0xff] %vm750_vm2, %v728_v27 }
 0x163   :  { %775 = vst.msk [vmem:[%s1734_s3 + $0xc0] sm:$0xff] %vm750_vm2, %v651_v28 }
 0x165   :  { %v561_v30 = vpop.f32.mrf.mxu2 }
 0x166   :  { %v562_v31 = vadd.f32 %v1215_v57, %v561_v30  ;;  %v483_v33 = vpop.f32.mrf.mxu0  ;;  %v737_v50 = vpop.f32.mrf.mxu3 }
 0x167   :  { %v655_v32 = vpop.f32.mrf.mxu1  ;;  %v484_v34 = vadd.f32 %v1215_v57, %v483_v33 }
 0x168   :  { %v731_v35 = vadd.f32 %v730_v21, %v562_v31 }
 0x169   :  { %v653_v36 = vadd.f32 %v652_v24, %v484_v34 }
 0x16a   :  { %807 = vst.msk [vmem:[%s1734_s3 + $0x1c0] sm:$0xff] %vm750_vm2, %v731_v35 }
 0x16b   :  { %776 = vst.msk [vmem:[%s1734_s3 + $0xc8] sm:$0xff] %vm750_vm2, %v653_v36 }
 0x16d   :  { %v563_v37 = vpop.f32.mrf.mxu2 }
 0x16e   :  { %v564_v39 = vadd.f32 %v1215_v57, %v563_v37  ;;  %v486_v41 = vpop.f32.mrf.mxu0  ;;  %v740_v61 = vpop.f32.mrf.mxu3 }
 0x16f   :  { %v657_v40 = vpop.f32.mrf.mxu1  ;;  %v487_v42 = vadd.f32 %v1215_v57, %v486_v41 }
 0x170   :  { %v733_v43 = vadd.f32 %v732_v29, %v564_v39 }
 0x171   :  { %v656_v44 = vadd.f32 %v655_v32, %v487_v42 }
 0x172   :  { %808 = vst.msk [vmem:[%s1734_s3 + $0x1c8] sm:$0xff] %vm750_vm2, %v733_v43 }
 0x173   :  { %777 = vst.msk [vmem:[%s1734_s3 + $0xd0] sm:$0xff] %vm750_vm2, %v656_v44 }
 0x175   :  { %v566_v45 = vpop.f32.mrf.mxu2 }
 0x176   :  { %v567_v46 = vadd.f32 %v1215_v57, %v566_v45  ;;  %v488_v48 = vpop.f32.mrf.mxu0  ;;  %v742_v5 = vpop.f32.mrf.mxu3 }
 0x177   :  { %v660_v47 = vpop.f32.mrf.mxu1  ;;  %v489_v49 = vadd.f32 %v1215_v57, %v488_v48 }
 0x178   :  { %v736_v51 = vadd.f32 %v735_v38, %v567_v46 }
 0x179   :  { %v658_v52 = vadd.f32 %v657_v40, %v489_v49 }
 0x17a   :  { %809 = vst.msk [vmem:[%s1734_s3 + $0x1d0] sm:$0xff] %vm750_vm2, %v736_v51 }
 0x17b   :  { %778 = vst.msk [vmem:[%s1734_s3 + $0xd8] sm:$0xff] %vm750_vm2, %v658_v52 }
 0x17d   :  { %v568_v53 = vpop.f32.mrf.mxu2 }
 0x17e   :  { %v569_v54 = vadd.f32 %v1215_v57, %v568_v53  ;;  %v491_v56 = vpop.f32.mrf.mxu0  ;;  %v745_v15 = vpop.f32.mrf.mxu3 }
 0x17f   :  { %v662_v55 = vpop.f32.mrf.mxu1  ;;  %v492_v58 = vadd.f32 %v1215_v57, %v491_v56 }
 0x180   :  { %v738_v59 = vadd.f32 %v737_v50, %v569_v54 }
 0x181   :  { %v661_v60 = vadd.f32 %v660_v47, %v492_v58 }
 0x182   :  { %810 = vst.msk [vmem:[%s1734_s3 + $0x1d8] sm:$0xff] %vm750_vm2, %v738_v59 }
 0x183   :  { %779 = vst.msk [vmem:[%s1734_s3 + $0xe0] sm:$0xff] %vm750_vm2, %v661_v60 }
 0x185   :  { %v571_v62 = vpop.f32.mrf.mxu2 }
 0x186   :  { %v572_v63 = vadd.f32 %v1215_v57, %v571_v62  ;;  %v493_v1 = vpop.f32.mrf.mxu0  ;;  %v747_v28 = vpop.f32.mrf.mxu3 }
 0x187   :  { %v665_v0 = vpop.f32.mrf.mxu1  ;;  %v494_v2 = vadd.f32 %v1215_v57, %v493_v1 }
 0x188   :  { %v741_v3 = vadd.f32 %v740_v61, %v572_v63 }
 0x189   :  { %v663_v4 = vadd.f32 %v662_v55, %v494_v2 }
 0x18a   :  { %811 = vst.msk [vmem:[%s1734_s3 + $0x1e0] sm:$0xff] %vm750_vm2, %v741_v3 }
 0x18b   :  { %780 = vst.msk [vmem:[%s1734_s3 + $0xe8] sm:$0xff] %vm750_vm2, %v663_v4 }
 0x18d   :  { %v573_v6 = vpop.f32.mrf.mxu2 }
 0x18e   :  { %v574_v8 = vadd.f32 %v1215_v57, %v573_v6  ;;  %v496_v10 = vpop.f32.mrf.mxu0 }
 0x18f   :  { %v667_v9 = vpop.f32.mrf.mxu1  ;;  %v497_v11 = vadd.f32 %v1215_v57, %v496_v10 }
 0x190   :  { %v743_v12 = vadd.f32 %v742_v5, %v574_v8 }
 0x191   :  { %v666_v13 = vadd.f32 %v665_v0, %v497_v11 }
 0x192   :  { %812 = vst.msk [vmem:[%s1734_s3 + $0x1e8] sm:$0xff] %vm750_vm2, %v743_v12 }
 0x193   :  { %781 = vst.msk [vmem:[%s1734_s3 + $0xf0] sm:$0xff] %vm750_vm2, %v666_v13 }
 0x195   :  { %v576_v16 = vpop.f32.mrf.mxu2 }
 0x196   :  { %v577_v17 = vadd.f32 %v1215_v57, %v576_v16  ;;  %v498_v20 = vpop.f32.mrf.mxu0 }
 0x197   :  { %v670_v18 = vpop.f32.mrf.mxu1  ;;  %v499_v22 = vadd.f32 %v1215_v57, %v498_v20 }
 0x198   :  { %v671_v21 = vadd.f32 %v670_v18, %v502_v14  ;;  %v746_v23 = vadd.f32 %v745_v15, %v577_v17 }
 0x199   :  { %v668_v24 = vadd.f32 %v667_v9, %v499_v22 }
 0x19a   :  { %783 = vst.msk [vmem:[%s1734_s3 + $0x100] sm:$0xff] %vm750_vm2, %v671_v21 }
 0x19b   :  { %813 = vst.msk [vmem:[%s1734_s3 + $0x1f0] sm:$0xff] %vm750_vm2, %v746_v23 }
 0x19c   :  { %782 = vst.msk [vmem:[%s1734_s3 + $0xf8] sm:$0xff] %vm750_vm2, %v668_v24 }
 0x19d   :  { %v578_v25 = vpop.f32.mrf.mxu2 }
 0x19e   :  { %v579_v26 = vadd.f32 %v1215_v57, %v578_v25 }
 0x19f   :  { %v672_v27 = vpop.f32.mrf.mxu1 }
 0x1a0   :  { %v673_v29 = vadd.f32 %v672_v27, %v504_v7  ;;  %v748_v30 = vadd.f32 %v747_v28, %v579_v26 }
 0x1a2   :  { %784 = vst.msk [vmem:[%s1734_s3 + $0x108] sm:$0xff] %vm750_vm2, %v673_v29 }
 0x1a3   :  { %814 = vst.msk [vmem:[%s1734_s3 + $0x1f8] sm:$0xff] %vm750_vm2, %v748_v30 }

</bundles_post_ra>
